<compile_context>
chip_gen: v6e
topology: v6e:2x2x1
jax: 0.10.0
libtpu: 0.0.40
codegen_flags: <defaults>
</compile_context>

<pallas_src>
import functools

import jax
import jax.numpy as jnp
from jax.experimental import pallas as pl
from jax.experimental.pallas import tpu as pltpu


def gated_skip_kernel(h_ref, bmap_ref, w1_hbm, b1_ref, w2row_ref, b2_ref, wm_hbm,
                      out_ref, w1_vmem, wm_vmem, sem, *, n_atoms):
    step = pl.program_id(0)

    @pl.when(step == 0)
    def _():
        # Zero the resident output block and stage the grid-invariant weight
        # matrices once into single-buffered VMEM scratch.
        out_ref[...] = jnp.zeros_like(out_ref)
        cp_w1 = pltpu.make_async_copy(w1_hbm, w1_vmem, sem.at[0])
        cp_wm = pltpu.make_async_copy(wm_hbm, wm_vmem, sem.at[1])
        cp_w1.start()
        cp_wm.start()
        cp_w1.wait()
        cp_wm.wait()

    tm = h_ref.shape[0]

    # Ragged tail: rows past n_atoms in the last tile hold garbage. Zero them
    # with a select (so even NaN garbage cannot propagate) before any matmul.
    row_ids = step * tm + jax.lax.broadcasted_iota(jnp.int32, (tm, 1), 0)
    valid = row_ids < n_atoms
    h = jnp.where(valid, h_ref[...], 0.0)                          # (tm, H) f32

    # One cast for the MXU feed (bf16 on v6e/v7x halves wm residency and feed
    # bytes); bias/ReLU/sigmoid/gating and accumulation stay in f32.
    h_mxu = h.astype(wm_vmem.dtype)

    # gate_nn: Linear(H, H//2) on the MXU, ReLU on the VPU; the (H//2 -> 1)
    # layer is a VPU multiply + lane reduction (keeps the MXU for real work).
    z1 = jnp.dot(h_mxu, w1_vmem[...], preferred_element_type=jnp.float32)
    z1 = jnp.maximum(z1 + b1_ref[...], 0.0)                        # (tm, H//2)
    logits = jnp.sum(z1 * w2row_ref[...], axis=-1, keepdims=True) + b2_ref[0, 0]
    alpha = jax.nn.sigmoid(logits)                                 # (tm, 1)

    # message_transform: Linear(H, H, bias=False)
    msgs = jnp.dot(h_mxu, wm_vmem[...], preferred_element_type=jnp.float32)
    gated = alpha * msgs                                           # (tm, H) f32

    # global_add_pool as a lane-dense one-hot matmul: (B, tm) @ (tm, H).
    # Tail rows contribute exactly zero because their gated rows are zero.
    seg = bmap_ref[...]                                            # (1, tm) int32
    mol_ids = jax.lax.broadcasted_iota(jnp.int32, (out_ref.shape[0], tm), 0)
    onehot = (seg == mol_ids).astype(jnp.float32)                  # (B, tm)

    out_ref[...] += jnp.dot(onehot, gated, preferred_element_type=jnp.float32)


def _vmem_limit_bytes(est_bytes):
    phys = None
    try:
        phys = int(pltpu.get_tpu_info().vmem_capacity_bytes)
    except Exception:
        phys = None
    if phys is None:
        cap = 48 * 1024 * 1024                       # safe on every generation
    elif phys <= 64 * 1024 * 1024:                   # v7x: leave compiler headroom
        cap = max(phys - 12 * 1024 * 1024, 32 * 1024 * 1024)
    else:                                            # v5e / v6e: 128 MiB physical
        cap = 100 * 1024 * 1024
    return int(min(max(2 * est_bytes + (16 << 20), 32 << 20), cap))


@functools.partial(jax.jit, static_argnames=("batch_size", "tile_atoms"))
def gated_skip_block(h_atoms, batch_map, params, batch_size, *, tile_atoms=512):
    """params must come from prepare_params() (weight prep is hoisted out of jit)."""
    n_atoms, hidden = h_atoms.shape
    half = params["w1"].shape[1]
    mxu_dtype = params["wm"].dtype
    mxu_bytes = jnp.dtype(mxu_dtype).itemsize

    # Stream h_atoms directly (no padded host copy). Tile the atom axis; the
    # ragged tail is masked inside the kernel. A single exact tile is used when
    # n_atoms fits (block == full array, so no (8,128) divisibility issue).
    if n_atoms <= tile_atoms:
        tm = n_atoms
    else:
        if tile_atoms % 128 != 0:
            raise ValueError("tile_atoms must be a multiple of 128")
        tm = tile_atoms
    n_tiles = pl.cdiv(n_atoms, tm)

    h_atoms = h_atoms.astype(jnp.float32)
    bmap2d = batch_map.astype(jnp.int32).reshape(1, n_atoms)

    # VMEM budget: double-buffered h/bmap tiles, single-buffered weights in
    # scratch, resident output block, plus per-step intermediates.
    est_bytes = (
        2 * tm * hidden * 4 + 2 * tm * 4                      # h + bmap (x2 bufs)
        + (hidden * half + hidden * hidden) * mxu_bytes       # w1 + wm scratch
        + 4 * 2 * 2 * half                                    # b1, w2 row (x2 bufs)
        + 2 * batch_size * hidden * 4                         # output block
        + (tm * (half + 2 * hidden) + batch_size * tm) * 4    # z1, msgs/gated, onehot
    )

    kernel = functools.partial(gated_skip_kernel, n_atoms=n_atoms)

    out = pl.pallas_call(
        kernel,
        out_shape=jax.ShapeDtypeStruct((batch_size, hidden), jnp.float32),
        grid_spec=pltpu.PrefetchScalarGridSpec(
            num_scalar_prefetch=0,
            grid=(n_tiles,),
            in_specs=[
                pl.BlockSpec((tm, hidden), lambda i: (i, 0)),        # h tile
                pl.BlockSpec((1, tm), lambda i: (0, i)),             # batch_map tile
                pl.BlockSpec(memory_space=pl.ANY),                   # w1 (HBM, staged once)
                pl.BlockSpec((1, half), lambda i: (0, 0)),           # b1 (resident)
                pl.BlockSpec((1, half), lambda i: (0, 0)),           # w2 row (resident)
                pl.BlockSpec(memory_space=pltpu.MemorySpace.SMEM),   # b2 scalar
                pl.BlockSpec(memory_space=pl.ANY),                   # wm (HBM, staged once)
            ],
            out_specs=pl.BlockSpec((batch_size, hidden), lambda i: (0, 0)),
            scratch_shapes=[
                pltpu.VMEM((hidden, half), mxu_dtype),               # w1, single buffer
                pltpu.VMEM((hidden, hidden), mxu_dtype),             # wm, single buffer
                pltpu.SemaphoreType.DMA((2,)),
            ],
        ),
        compiler_params=pltpu.CompilerParams(
            dimension_semantics=("arbitrary",),   # shared accumulator across atom tiles
            vmem_limit_bytes=_vmem_limit_bytes(est_bytes),
        ),
    )(h_atoms, bmap2d, params["w1"], params["b1"], params["w2row"], params["b2"],
      params["wm"])

    # TODO(synk): v7x 2-TensorCore split — add a 'parallel' axis over column tiles
    # of wm/out (recompute the cheap gate per column tile); do NOT mark the atom
    # axis 'parallel' as-is, the shared output accumulator would be incorrect.
    return out


def prepare_params(params, *, mxu_dtype=jnp.float32):
    """One-time (outside jit) weight prep: kernel layouts + optional bf16 MXU feed."""
    half = params["w1"].shape[1]
    return {
        "w1": params["w1"].astype(mxu_dtype),                      # (H, H//2)
        "b1": params["b1"].reshape(1, half).astype(jnp.float32),   # (1, H//2)
        "w2row": params["w2"].reshape(1, half).astype(jnp.float32),
        "b2": params["b2"].reshape(1, 1).astype(jnp.float32),
        "wm": params["wm"].astype(mxu_dtype),                      # (H, H)
    }


def init_params(key, hidden):
    k1, k2, k3, k4, k5 = jax.random.split(key, 5)
    half = hidden // 2
    # Weights stored as (in, out) so the kernel does x @ W (equivalent to
    # PyTorch's x @ W.T with W of shape (out, in)).
    return {
        "w1": jax.random.normal(k1, (hidden, half), jnp.float32) * 0.1,
        "b1": jax.random.normal(k2, (1, half), jnp.float32) * 0.1,
        "w2": jax.random.normal(k3, (half, 1), jnp.float32) * 0.1,
        "b2": jax.random.normal(k4, (1, 1), jnp.float32) * 0.1,
        "wm": jax.random.normal(k5, (hidden, hidden), jnp.float32) * 0.1,
    }


def reference(h_atoms, batch_map, params, batch_size):
    z1 = jnp.maximum(h_atoms @ params["w1"] + params["b1"], 0.0)
    alpha = jax.nn.sigmoid(z1 @ params["w2"] + params["b2"])
    msgs = h_atoms @ params["wm"]
    gated = alpha * msgs
    return jax.ops.segment_sum(gated, batch_map, num_segments=batch_size)


if __name__ == "__main__":
    key = jax.random.PRNGKey(0)
    k_h, k_p, k_h2, k_b2 = jax.random.split(key, 4)

    hidden = 32
    raw = init_params(k_p, hidden)
    params_f32 = prepare_params(raw)                              # f32 MXU feed
    params_bf16 = prepare_params(raw, mxu_dtype=jnp.bfloat16)     # v6e/v7x fast path

    # Test 1: small, evenly divisible batch (single exact atom tile).
    batch_size = 4
    n_atoms = 24
    h1 = jax.random.normal(k_h, (n_atoms, hidden), jnp.float32)
    bmap1 = jnp.repeat(jnp.arange(batch_size, dtype=jnp.int32), n_atoms // batch_size)
    out1 = jax.block_until_ready(gated_skip_block(h1, bmap1, params_f32, batch_size))
    ref1 = reference(h1, bmap1, raw, batch_size)
    assert out1.shape == (batch_size, hidden)
    assert jnp.allclose(out1, ref1, atol=1e-4, rtol=1e-4), "mismatch vs reference (test 1)"

    # Test 2: ragged atom count, default tile (single 200-row tile, no padding).
    batch_size2 = 5
    n_atoms2 = 200
    h2 = jax.random.normal(k_h2, (n_atoms2, hidden), jnp.float32)
    bmap2 = jax.random.randint(k_b2, (n_atoms2,), 0, batch_size2, jnp.int32)
    out2 = jax.block_until_ready(gated_skip_block(h2, bmap2, params_f32, batch_size2))
    ref2 = reference(h2, bmap2, raw, batch_size2)
    assert out2.shape == (batch_size2, hidden)
    assert jnp.allclose(out2, ref2, atol=1e-4, rtol=1e-4), "mismatch vs reference (test 2)"

    # Test 3: force multiple grid steps + in-kernel tail masking (tm=128, 2 steps).
    out3 = jax.block_until_ready(
        gated_skip_block(h2, bmap2, params_f32, batch_size2, tile_atoms=128))
    assert jnp.allclose(out3, ref2, atol=1e-4, rtol=1e-4), "mismatch vs reference (test 3)"

    # Test 4: bf16 MXU feed (v6e/v7x option); looser tolerance vs the f32 reference.
    out4 = jax.block_until_ready(
        gated_skip_block(h2, bmap2, params_bf16, batch_size2, tile_atoms=128))
    assert jnp.allclose(out4, ref2, atol=5e-2, rtol=5e-2), "mismatch vs reference (test 4)"

    print("KERNEL_OK")
</pallas_src>

<mosaic_0001>
module attributes {stable_mosaic.version = 11 : i64} {
  func.func @gated_skip_kernel(%arg0: i32, %arg1: memref<24x32xf32, #tpu.memory_space<vmem>>, %arg2: memref<1x24xi32, #tpu.memory_space<vmem>>, %arg3: memref<32x16xf32, #tpu.memory_space<any>>, %arg4: memref<1x16xf32, #tpu.memory_space<vmem>>, %arg5: memref<1x16xf32, #tpu.memory_space<vmem>>, %arg6: memref<1x1xf32, #tpu.memory_space<smem>>, %arg7: memref<32x32xf32, #tpu.memory_space<any>>, %arg8: memref<4x32xf32, #tpu.memory_space<vmem>>, %arg9: memref<32x16xf32, #tpu.memory_space<vmem>>, %arg10: memref<32x32xf32, #tpu.memory_space<vmem>>, %arg11: memref<2x!tpu.dma_semaphore, #tpu.memory_space<semaphore_mem>>) attributes {dimension_semantics = [#tpu.dimension_semantics<arbitrary>], iteration_bounds = array<i64: 1>, scalar_prefetch = 0 : i64, scratch_operands = 3 : i64, tpu.core_type = #tpu.core_type<tc>, window_params = [{transform_indices = @transform_0, window_bounds = array<i64: 24, 32>}, {transform_indices = @transform_1, window_bounds = array<i64: 1, 24>}, {}, {pipeline_mode = #tpu.pipeline_mode<synchronous>, transform_indices = @transform_3, window_bounds = array<i64: 1, 16>}, {pipeline_mode = #tpu.pipeline_mode<synchronous>, transform_indices = @transform_4, window_bounds = array<i64: 1, 16>}, {transform_indices = @transform_5, window_bounds = array<i64: 1, 1>}, {}, {pipeline_mode = #tpu.pipeline_mode<synchronous>, transform_indices = @transform_7, window_bounds = array<i64: 4, 32>}]} {
    %c0_i32 = arith.constant 0 : i32
    %0 = arith.cmpi eq, %arg0, %c0_i32 : i32
    %1 = arith.extui %0 : i1 to i32
    %c0_i32_0 = arith.constant 0 : i32
    %2 = arith.cmpi ne, %1, %c0_i32_0 : i32
    scf.if %2 {
      %cst_25 = arith.constant 0.000000e+00 : f32
      %48 = vector.broadcast %cst_25 : f32 to vector<4x32xf32>
      %c0_26 = arith.constant 0 : index
      %c0_27 = arith.constant 0 : index
      %49 = vector.load %arg8[%c0_26, %c0_27] : memref<4x32xf32, #tpu.memory_space<vmem>>, vector<4x32xf32>
      tpu.vector_store %arg8[%c0_26, %c0_27], %48 {strides = array<i32>} : memref<4x32xf32, #tpu.memory_space<vmem>>, vector<4x32xf32>,
      %c0_i32_28 = arith.constant 0 : i32
      %50 = tpu.memref_slice %arg11[%c0_i32_28] : memref<2x!tpu.dma_semaphore, #tpu.memory_space<semaphore_mem>> -> memref<1x!tpu.dma_semaphore, #tpu.memory_space<semaphore_mem>>
      %51 = tpu.memref_squeeze %50 : memref<1x!tpu.dma_semaphore, #tpu.memory_space<semaphore_mem>> -> memref<!tpu.dma_semaphore, #tpu.memory_space<semaphore_mem>>
      tpu.enqueue_dma source(%arg3 : memref<32x16xf32, #tpu.memory_space<any>>) target(%arg9 : memref<32x16xf32, #tpu.memory_space<vmem>>) target_semaphore(%51 : memref<!tpu.dma_semaphore, #tpu.memory_space<semaphore_mem>>)
      %c1_i32 = arith.constant 1 : i32
      %52 = tpu.memref_slice %arg11[%c1_i32] : memref<2x!tpu.dma_semaphore, #tpu.memory_space<semaphore_mem>> -> memref<1x!tpu.dma_semaphore, #tpu.memory_space<semaphore_mem>>
      %53 = tpu.memref_squeeze %52 : memref<1x!tpu.dma_semaphore, #tpu.memory_space<semaphore_mem>> -> memref<!tpu.dma_semaphore, #tpu.memory_space<semaphore_mem>>
      tpu.enqueue_dma source(%arg7 : memref<32x32xf32, #tpu.memory_space<any>>) target(%arg10 : memref<32x32xf32, #tpu.memory_space<vmem>>) target_semaphore(%53 : memref<!tpu.dma_semaphore, #tpu.memory_space<semaphore_mem>>)
      %c0_i32_29 = arith.constant 0 : i32
      %54 = tpu.memref_slice %arg11[%c0_i32_29] : memref<2x!tpu.dma_semaphore, #tpu.memory_space<semaphore_mem>> -> memref<1x!tpu.dma_semaphore, #tpu.memory_space<semaphore_mem>>
      %55 = tpu.memref_squeeze %54 : memref<1x!tpu.dma_semaphore, #tpu.memory_space<semaphore_mem>> -> memref<!tpu.dma_semaphore, #tpu.memory_space<semaphore_mem>>
      tpu.wait_dma2 semaphore(%55 : memref<!tpu.dma_semaphore, #tpu.memory_space<semaphore_mem>>) src(%arg3 : memref<32x16xf32, #tpu.memory_space<any>>) dst(%arg9 : memref<32x16xf32, #tpu.memory_space<vmem>>)
      %c1_i32_30 = arith.constant 1 : i32
      %56 = tpu.memref_slice %arg11[%c1_i32_30] : memref<2x!tpu.dma_semaphore, #tpu.memory_space<semaphore_mem>> -> memref<1x!tpu.dma_semaphore, #tpu.memory_space<semaphore_mem>>
      %57 = tpu.memref_squeeze %56 : memref<1x!tpu.dma_semaphore, #tpu.memory_space<semaphore_mem>> -> memref<!tpu.dma_semaphore, #tpu.memory_space<semaphore_mem>>
      tpu.wait_dma2 semaphore(%57 : memref<!tpu.dma_semaphore, #tpu.memory_space<semaphore_mem>>) src(%arg7 : memref<32x32xf32, #tpu.memory_space<any>>) dst(%arg10 : memref<32x32xf32, #tpu.memory_space<vmem>>)
    } else {
    }
    %c24_i32 = arith.constant 24 : i32
    %3 = arith.muli %arg0, %c24_i32 : i32
    %4 = tpu.iota {dimensions = array<i32: 0>} : vector<24x1xi32>
    %5 = vector.broadcast %3 : i32 to vector<24x1xi32>
    %6 = arith.addi %5, %4 : vector<24x1xi32>
    %c24_i32_1 = arith.constant 24 : i32
    %7 = vector.broadcast %c24_i32_1 : i32 to vector<24x1xi32>
    %8 = arith.cmpi slt, %6, %7 : vector<24x1xi32>
    %c0 = arith.constant 0 : index
    %c0_2 = arith.constant 0 : index
    %9 = vector.load %arg1[%c0, %c0_2] : memref<24x32xf32, #tpu.memory_space<vmem>>, vector<24x32xf32>
    %cst = arith.constant 0.000000e+00 : f32
    %10 = vector.shape_cast %8 : vector<24x1xi1> to vector<24x1xi1>
    %11 = vector.broadcast %10 : vector<24x1xi1> to vector<24x32xi1>
    %12 = vector.broadcast %cst : f32 to vector<24x32xf32>
    %13 = arith.select %11, %9, %12 : vector<24x32xi1>, vector<24x32xf32>
    %c0_3 = arith.constant 0 : index
    %c0_4 = arith.constant 0 : index
    %14 = vector.load %arg9[%c0_3, %c0_4] : memref<32x16xf32, #tpu.memory_space<vmem>>, vector<32x16xf32>
    %cst_5 = arith.constant dense<0.000000e+00> : vector<24x16xf32>
    %15 = tpu.matmul %13, %14, %cst_5 {dimension_numbers = #tpu.dot_dimension_numbers<[1], [0], [0], [1], [0, 0, 1, 1], [], []>} : vector<24x32xf32>, vector<32x16xf32>, vector<24x16xf32> -> vector<24x16xf32>
    %c0_6 = arith.constant 0 : index
    %c0_7 = arith.constant 0 : index
    %16 = vector.load %arg4[%c0_6, %c0_7] : memref<1x16xf32, #tpu.memory_space<vmem>>, vector<1x16xf32>
    %17 = vector.broadcast %16 : vector<1x16xf32> to vector<24x16xf32>
    %18 = arith.addf %15, %17 : vector<24x16xf32>
    %cst_8 = arith.constant 0.000000e+00 : f32
    %19 = vector.broadcast %cst_8 : f32 to vector<24x16xf32>
    %20 = arith.maximumf %18, %19 : vector<24x16xf32>
    %c0_9 = arith.constant 0 : index
    %c0_10 = arith.constant 0 : index
    %21 = vector.load %arg5[%c0_9, %c0_10] : memref<1x16xf32, #tpu.memory_space<vmem>>, vector<1x16xf32>
    %22 = vector.broadcast %21 : vector<1x16xf32> to vector<24x16xf32>
    %23 = arith.mulf %20, %22 : vector<24x16xf32>
    %cst_11 = arith.constant dense<0.000000e+00> : vector<24xf32>
    %24 = vector.multi_reduction <add>, %23, %cst_11 [1] : vector<24x16xf32> to vector<24xf32>
    %25 = vector.shape_cast %24 : vector<24xf32> to vector<24x1xf32>
    %c0_12 = arith.constant 0 : index
    %c0_13 = arith.constant 0 : index
    %26 = memref.load %arg6[%c0_12, %c0_13] : memref<1x1xf32, #tpu.memory_space<smem>>
    %27 = vector.broadcast %26 : f32 to vector<24x1xf32>
    %28 = arith.addf %25, %27 : vector<24x1xf32>
    %29 = arith.negf %28 : vector<24x1xf32>
    %30 = math.exp %29 : vector<24x1xf32>
    %cst_14 = arith.constant 1.000000e+00 : f32
    %31 = vector.broadcast %cst_14 : f32 to vector<24x1xf32>
    %32 = arith.addf %31, %30 : vector<24x1xf32>
    %33 = arith.divf %31, %32 : vector<24x1xf32>
    %c0_15 = arith.constant 0 : index
    %c0_16 = arith.constant 0 : index
    %34 = vector.load %arg10[%c0_15, %c0_16] : memref<32x32xf32, #tpu.memory_space<vmem>>, vector<32x32xf32>
    %cst_17 = arith.constant dense<0.000000e+00> : vector<24x32xf32>
    %35 = tpu.matmul %13, %34, %cst_17 {dimension_numbers = #tpu.dot_dimension_numbers<[1], [0], [0], [1], [0, 0, 1, 1], [], []>} : vector<24x32xf32>, vector<32x32xf32>, vector<24x32xf32> -> vector<24x32xf32>
    %36 = vector.broadcast %33 : vector<24x1xf32> to vector<24x32xf32>
    %37 = arith.mulf %36, %35 : vector<24x32xf32>
    %c0_18 = arith.constant 0 : index
    %c0_19 = arith.constant 0 : index
    %38 = vector.load %arg2[%c0_18, %c0_19] : memref<1x24xi32, #tpu.memory_space<vmem>>, vector<1x24xi32>
    %39 = tpu.iota {dimensions = array<i32: 0>} : vector<4x24xi32>
    %40 = vector.broadcast %38 : vector<1x24xi32> to vector<4x24xi32>
    %41 = arith.cmpi eq, %40, %39 : vector<4x24xi32>
    %42 = arith.extui %41 : vector<4x24xi1> to vector<4x24xi32>
    %43 = arith.sitofp %42 : vector<4x24xi32> to vector<4x24xf32>
    %c0_20 = arith.constant 0 : index
    %c0_21 = arith.constant 0 : index
    %44 = vector.load %arg8[%c0_20, %c0_21] : memref<4x32xf32, #tpu.memory_space<vmem>>, vector<4x32xf32>
    %cst_22 = arith.constant dense<0.000000e+00> : vector<4x32xf32>
    %45 = tpu.matmul %43, %37, %cst_22 {dimension_numbers = #tpu.dot_dimension_numbers<[1], [0], [0], [1], [0, 0, 1, 1], [], []>} : vector<4x24xf32>, vector<24x32xf32>, vector<4x32xf32> -> vector<4x32xf32>
    %46 = arith.addf %44, %45 : vector<4x32xf32>
    %c0_23 = arith.constant 0 : index
    %c0_24 = arith.constant 0 : index
    %47 = vector.load %arg8[%c0_23, %c0_24] : memref<4x32xf32, #tpu.memory_space<vmem>>, vector<4x32xf32>
    tpu.vector_store %arg8[%c0_23, %c0_24], %46 {strides = array<i32>} : memref<4x32xf32, #tpu.memory_space<vmem>>, vector<4x32xf32>,
    return
  }
  func.func @transform_0(%arg0: i32) -> (i32, i32) {
    %c0_i32 = arith.constant 0 : i32
    %c0_i32_0 = arith.constant 0 : i32
    return %arg0, %c0_i32 : i32, i32
  }
  func.func @transform_1(%arg0: i32) -> (i32, i32) {
    %c0_i32 = arith.constant 0 : i32
    %c0_i32_0 = arith.constant 0 : i32
    return %c0_i32, %arg0 : i32, i32
  }
  func.func @transform_3(%arg0: i32) -> (i32, i32) {
    %c0_i32 = arith.constant 0 : i32
    %c0_i32_0 = arith.constant 0 : i32
    %c0_i32_1 = arith.constant 0 : i32
    return %c0_i32, %c0_i32_0 : i32, i32
  }
  func.func @transform_4(%arg0: i32) -> (i32, i32) {
    %c0_i32 = arith.constant 0 : i32
    %c0_i32_0 = arith.constant 0 : i32
    %c0_i32_1 = arith.constant 0 : i32
    return %c0_i32, %c0_i32_0 : i32, i32
  }
  func.func @transform_5(%arg0: i32) -> (i32, i32) {
    %c0_i32 = arith.constant 0 : i32
    %c0_i32_0 = arith.constant 0 : i32
    %c0_i32_1 = arith.constant 0 : i32
    return %c0_i32, %c0_i32_0 : i32, i32
  }
  func.func @transform_7(%arg0: i32) -> (i32, i32) {
    %c0_i32 = arith.constant 0 : i32
    %c0_i32_0 = arith.constant 0 : i32
    %c0_i32_1 = arith.constant 0 : i32
    return %c0_i32, %c0_i32_0 : i32, i32
  }
}

</mosaic_0001>

<bundles_post_ra>
// kernel: gated_skip_block.1
= control target key start
LH: loop header
LB: loop body
LE: loop exit
PB: predicated region body
PF: predicated region fallthrough
CT: control target
= control target key end

     0   :  { %13 = vsyncpa [#allocation7], 0  ;;  %vm28_vm0 = vcmask 257024   ;;  %v639_v2 = vmov 0.0   ;;  %s765_s0 = inlined_call_operand.vmem [shape: f32[24,32], index: 0, kind: input, shape index: {}]   ;;  %s766_s1 = inlined_call_operand.vmem [shape: s32[1,24], index: 1, kind: input, shape index: {}]   ;;  %s767_s2 = inlined_call_operand.vmem [shape: f32[32,16], index: 2, kind: input, shape index: {}]   ;;  %s768_s3 = inlined_call_operand.vmem [shape: f32[1,16], index: 3, kind: input, shape index: {}]   ;;  %s769_s4 = inlined_call_operand.vmem [shape: f32[1,16], index: 4, kind: input, shape index: {}]   ;;  %s770_s5 = inlined_call_operand.<no memory space> [shape: f32[1,1], index: 5, kind: input, shape index: {}]   ;;  %s771_s6 = inlined_call_operand.vmem [shape: f32[32,32], index: 6, kind: input, shape index: {}]   ;;  %s772_s7 = inlined_call_operand.hbm [shape: f32[4,32], index: 7, kind: output, shape index: {}]  }
   0x1   :  { %v63_v0 = vld [vmem:[%s767_s2] sm:$0xff]  ;;  %v65_v1 = vld [vmem:[%s767_s2 + $0x8] sm:$0xff]  ;;  %29 = vst.msk [vmem:[#allocation6] sm:$0xf] %vm28_vm0, %v639_v2  ;;  %v67_v3 = vld [vmem:[%s767_s2 + $0x10] sm:$0xff] }
   0x2   :  { %v69_v4 = vld [vmem:[%s767_s2 + $0x18] sm:$0xff] }
   0x3   :  { %78 = vsyncadd [#allocation4], 512  ;;  %v113_v5 = vld [vmem:[%s771_s6] sm:$0xff]  ;;  %v115_v6 = vld [vmem:[%s771_s6 + $0x8] sm:$0xff] }
   0x4   :  { %v117_v7 = vld [vmem:[%s771_s6 + $0x10] sm:$0xff]  ;;  %v119_v8 = vld [vmem:[%s771_s6 + $0x18] sm:$0xff] }
   0x5   :  { %128 = vsyncadd [#allocation4 + $0x1], 512 }
   0x6   :  { %633 = dma.done.wait [#allocation4], 512 }
   0x7   :  { %634 = vsyncadd [#allocation4], 4294966784 }
   0x8   :  { %635 = dma.done.wait [#allocation4 + $0x1], 512 }
   0x9   :  { %636 = vsyncadd [#allocation4 + $0x1], 4294966784  ;;  %555 = vmatprep.subr.mxu0 %v639_v2  ;;  %572 = vmatprep.subr.mxu1 %v639_v2  ;;  %vm640_vm1 = vmmov 0   ;;  %vm169_vm2 = vcmask 261120   ;;  %v146_v9 = vld [vmem:[%s765_s0] sm:$0xff]  ;;  %v147_v10 = vld [vmem:[%s765_s0 + $0x8] sm:$0xff]  ;;  %v283_v38 = vstv %s770_s5  ;;  %v135_v54 = vlaneseq }
   0xa   :  { %556 = vmatpush3.msra.mxu0 %v69_v4  ;;  %563 = vmatprep.mubr.msk.f32.mxu0 %vm640_vm1, %v639_v2  ;;  %v148_v11 = vld [vmem:[%s765_s0 + $0x10] sm:$0xff]  ;;  %v521_v12 = vld [vmem:[%s768_s3] ss:$0 sm:$0xff]  ;;  %vm272_vm3 = vcmask 130048   ;;  %vm401_vm5 = vcmask 195584   ;;  %s641_s25 = smov [#allocation6]  }
   0xb   :  { %557 = vmatprep.subr.mxu0 %v639_v2  ;;  %573 = vmatpush3.msra.mxu1 %v119_v8  ;;  %v525_v16 = vld [vmem:[%s769_s4] ss:$0 sm:$0xff]  ;;  %v136_v56 = vshrl.u32 %v135_v54, 7  ;;  %s484_s26 = sshll.u32 %s641_s25, 4  ;;  %s485_s26 = int_to_ptr.vmem [resolvable:$true] %s484_s26 }
   0xc   :  { %558 = vmatpush3.msra.mxu0 %v67_v3  ;;  %574 = vmatprep.subr.mxu1 %v639_v2  ;;  %v532_v58 = vld [vmem:[%s766_s1] ss:$0 sm:$0xff]  ;;  %s613_s1 = scalar_lea.vmem %s485_s26, 64  ;;  %p618_p1 = scmp.lt.s32.totalorder %s485_s26, %s485_s26 }
   0xd   :  { %559 = vmatprep.subr.mxu0 %v639_v2  ;;  %575 = vmatpush3.msra.mxu1 %v117_v7  ;;  %vm397_vm4 = vcmp.eq.s32.totalorder %v532_v58, %v136_v56  ;;  %p614_p0 = scmp.ne.s32.totalorder %s485_s26, %s613_s1  ;;  %p619_p2 = scmp.lt.s32.totalorder %s613_s1, %s613_s1 }
   0xe   :  { %560 = vmatpush3.msra.mxu0 %v65_v1  ;;  %576 = vmatprep.subr.mxu1 %v639_v2  ;;  %v533_v63 = vsel %vm397_vm4, 1.0, %v639_v2 }
   0xf   :  { %561 = vmatprep.subr.mxu0 %v639_v2  ;;  %577 = vmatpush3.msra.mxu1 %v115_v6  ;;  %p620_p3 = por %p619_p2, %p618_p1 }
  0x10   :  { %562 = vmatpush3.msra.mxu0 %v63_v0  ;;  %578 = vmatprep.subr.mxu1 %v639_v2  ;;  %v400_v0 = vld [vmem:[#allocation6] sm:$0xf] }
  0x11   :  { %564 = vmatmul.mubr.msk.f32.vlgmr.msra.gmra.mxu0 %vm169_vm2, %v146_v9  ;;  %579 = vmatpush3.msra.mxu1 %v113_v5  ;;  %p621_p4 = pnand %p620_p3, %p614_p0 }
  0x12   :  { %566 = vmatprep.mubr.msk.f32.mxu0 %vm640_vm1, %v639_v2  ;;  %580 = vmatprep.mubr.msk.f32.mxu1 %vm640_vm1, %v639_v2 }
  0x13   :  { %581 = vmatmul.mubr.msk.f32.vlgmr.msra.gmra.mxu1 %vm169_vm2, %v146_v9  ;;  %589 = vmatprep.subr.mxu0 %v639_v2 }
  0x14   :  { %583 = vmatprep.mubr.msk.f32.mxu1 %vm640_vm1, %v639_v2 }
  0x15   :  { %567 = vmatmul.mubr.msk.f32.gmra.mxu0 %vm169_vm2, %v147_v10 }
  0x16   :  { %569 = vmatprep.mubr.msk.f32.mxu0 %vm640_vm1, %v639_v2 }
  0x17   :  { %584 = vmatmul.mubr.msk.f32.gmra.mxu1 %vm169_vm2, %v147_v10 }
  0x18   :  { %586 = vmatprep.mubr.msk.f32.mxu1 %vm640_vm1, %v639_v2 }
  0x19   :  { %570 = vmatmul.mubr.msk.f32.gmra.mxu0 %vm169_vm2, %v148_v11 }
  0x1a   :  { %595 = vmatprep.mubr.msk.f32.mxu0 %vm640_vm1, %v639_v2 }
  0x1b   :  { %587 = vmatmul.mubr.msk.f32.gmra.mxu1 %vm169_vm2, %v148_v11 }
  0xd1   :  { %v245_v13 = vpop.f32.mrf.mxu0 }
  0xd2   :  { %v246_v14 = vadd.f32 %v521_v12, %v245_v13 }
  0xd3   :  { %v565_v15 = vpop.f32.mrf.mxu0  ;;  %v375_v32 = vpop.f32.mrf.mxu1 }
  0xd4   :  { %v259_v17 = vmax.f32 %v246_v14, 0.0 }
  0xd5   :  { %v250_v18 = vpop.f32.mrf.mxu0  ;;  %v582_v33 = vpop.f32.mrf.mxu1 }
  0xd6   :  { %v269_v19 = vmul.f32 %v525_v16, %v259_v17  ;;  %v251_v21 = vadd.f32 %v521_v12, %v250_v18 }
  0xd7   :  { %v568_v20 = vpop.f32.mrf.mxu0  ;;  %v380_v34 = vpop.f32.mrf.mxu1 }
  0xd8   :  { %v273_v22 = vsel %vm272_vm3, %v269_v19, 0.0  ;;  %v260_v26 = vmax.f32 %v251_v21, 0.0 }
  0xd9   :  { %274 = vadd.xlane.f32.xlu1 %v273_v22  ;;  %v255_v23 = vpop.f32.mrf.mxu0  ;;  %v585_v35 = vpop.f32.mrf.mxu1 }
  0xda   :  { %v256_v24 = vadd.f32 %v521_v12, %v255_v23  ;;  %v270_v30 = vmul.f32 %v525_v16, %v260_v26 }
  0xdb   :  { %v571_v25 = vpop.f32.mrf.mxu0  ;;  %v385_v36 = vpop.f32.mrf.mxu1 }
  0xdc   :  { %v261_v27 = vmax.f32 %v256_v24, 0.0  ;;  %v276_v31 = vsel %vm272_vm3, %v270_v30, 0.0 }
  0xdd   :  { %v588_v37 = vpop.f32.mrf.mxu1 }
  0xde   :  { %v271_v28 = vmul.f32 %v525_v16, %v261_v27 }
  0xe0   :  { %v279_v29 = vsel %vm272_vm3, %v271_v28, 0.0 }
  0xe1   :  { %280 = vadd.xlane.f32.xlu0 %v279_v29 }
  0xe5   :  { %277 = vadd.xlane.f32.xlu0 %v276_v31 }
 0x162   :  { %v275_v39 = vpop.xlane.xlu1 %274 }
 0x163   :  { %v284_v40 = vadd.f32 %v283_v38, %v275_v39 }
 0x165   :  { %v526_v41 = vmul.f32 -1.442695, %v284_v40 }
 0x167   :  { %601 = vpow2.f32 %v526_v41 }
 0x16a   :  { %v281_v42 = vpop.xlane.xlu0 %280 }
 0x16b   :  { %v286_v43 = vadd.f32 %v283_v38, %v281_v42 }
 0x16d   :  { %v528_v44 = vmul.f32 -1.442695, %v286_v43 }
 0x16e   :  { %v278_v45 = vpop.xlane.xlu0 %277 }
 0x16f   :  { %603 = vpow2.f32 %v528_v44  ;;  %v285_v46 = vadd.f32 %v283_v38, %v278_v45 }
 0x171   :  { %v527_v47 = vmul.f32 -1.442695, %v285_v46 }
 0x173   :  { %605 = vpow2.f32 %v527_v47 }
 0x174   :  { %v602_v48 = vpop.eup %601 }
 0x175   :  { %v296_v51 = vadd.f32 1.0, %v602_v48 }
 0x17c   :  { %v604_v49 = vpop.eup %603 }
 0x17d   :  { %v298_v50 = vadd.f32 1.0, %v604_v49 }
 0x17f   :  { %607 = vrcp.f32 %v298_v50 }
 0x180   :  { %v606_v52 = vpop.eup %605  ;;  %609 = vrcp.f32 %v296_v51 }
 0x181   :  { %v297_v53 = vadd.f32 1.0, %v606_v52 }
 0x183   :  { %611 = vrcp.f32 %v297_v53 }
 0x18c   :  { %v608_v55 = vpop.eup %607 }
 0x18d   :  { %v391_v57 = vmul.f32 %v608_v55, %v385_v36  ;;  %v610_v59 = vpop.eup %609 }
 0x18e   :  { %v389_v62 = vmul.f32 %v610_v59, %v375_v32 }
 0x18f   :  { %590 = vmatpush3.msra.mxu0 %v391_v57 }
 0x190   :  { %v612_v60 = vpop.eup %611  ;;  %591 = vmatprep.subr.mxu0 %v639_v2 }
 0x191   :  { %v390_v61 = vmul.f32 %v612_v60, %v380_v34 }
 0x193   :  { %592 = vmatpush3.msra.mxu0 %v390_v61 }
 0x194   :  { %593 = vmatprep.subr.mxu0 %v639_v2 }
 0x195   :  { %594 = vmatpush3.msra.mxu0 %v389_v62 }
 0x196   :  { %596 = vmatmul.mubr.msk.f32.vlgmr.msra.gmra.mxu0 %vm401_vm5, %v533_v63 }
 0x256   :  { %v471_v1 = vpop.f32.mrf.mxu0 }
 0x257   :  { %v475_v3 = vadd.f32 %v471_v1, %v400_v0 }
 0x258   :  { %v597_v4 = vpop.f32.mrf.mxu0 }
 0x259   :  { %477 = vst.msk [vmem:[#allocation6] sm:$0xf] %vm28_vm0, %v475_v3 }
 0x25a   :  { %624 = shalt.err (!%p621_p4)
}
 0x25b   :  { %487 = dma.vmem_to_hbm [thread:$0]  %s485_s26, 64, %s772_s7, [#allocation7]  }
 0x25c   :  { %637 = dma.done.wait [#allocation7], 64  }
 0x25d   :  { %638 = vsyncadd [#allocation7], 4294967232 }
 0x25e   :  { %491 = vsyncpa [#allocation7], 1 }
 0x25f   :  { %492 = vsyncmov [#allocation4] }
 0x262   :  { %s493_s29 = vpop.sfrf %492 }
 0x263   :  { %p535_p5 = scmp.ne.s32.totalorder %s493_s29, 0 }
 0x265   :  { %497 = shalt.err (%p535_p5)  }
 0x266   :  { %499 = vsyncmov [#allocation4 + $0x1] }
 0x269   :  { %s500_s30 = vpop.sfrf %499 }
 0x26a   :  { %p536_p6 = scmp.ne.s32.totalorder %s500_s30, 0 }
 0x26c   :  { %504 = shalt.err (%p536_p6)  }

</bundles_post_ra>
